<compile_context>
chip_gen: v6e
topology: v6e:2x2x1
jax: 0.10.0
libtpu: 0.0.40
codegen_flags: <defaults>
</compile_context>

<pallas_src>
import math

import jax
import jax.numpy as jnp
from jax.experimental import pallas as pl
from jax.experimental.pallas import tpu as pltpu


def _round_up(x: int, m: int) -> int:
    return ((x + m - 1) // m) * m


def _vmem_capacity_bytes() -> int:
    """Per-TensorCore VMEM capacity; conservative fallback = v7x (64 MiB)."""
    try:
        info = pltpu.get_tpu_info()
        cap = getattr(info, "vmem_capacity_bytes", None)
        if cap:
            return int(cap)
    except Exception:
        pass
    return 64 * 1024 * 1024


def _make_emb_kernel(scale: float, vocab_size: int):
    def emb_kernel(tok_ref, tab_ref, o_ref):
        # tok_ref: VMEM (T, 1) int32 token ids for this block
        # tab_ref: VMEM (V, E) embedding table (resident, same block every step)
        # o_ref:   VMEM (T, E) output tile
        #
        # Clamp in-kernel: rides free VPU slack in a DMA-bound kernel and
        # removes the separate wrapper-side XLA clamp pass over the ids.
        tok = jnp.clip(tok_ref[...], 0, vocab_size - 1)            # (T, 1)
        block_tokens = tok.shape[0]
        vocab_ids = jax.lax.broadcasted_iota(
            jnp.int32, (block_tokens, vocab_size), 1)              # (T, V)
        # Fold sqrt(E) into the one-hot: T*V multiplies instead of T*E, and it
        # is exact because each one-hot row has exactly one nonzero.
        one_hot = (vocab_ids == tok).astype(jnp.float32) * scale   # (T, V)
        rows = jnp.dot(one_hot, tab_ref[...].astype(jnp.float32),
                       preferred_element_type=jnp.float32)         # (T, E)
        o_ref[...] = rows.astype(o_ref.dtype)

    return emb_kernel


def token_embedding(tokens: jax.Array, emb_table: jax.Array,
                    *, block_tokens: int = 2048) -> jax.Array:
    """Pallas equivalent of TokenEmbedding.forward.

    tokens:    [B, S] integer array
    emb_table: [V, E] float weights
    returns:   [B, S, E] = emb_table[tokens] * sqrt(E)
    """
    vocab_size, emb_size = emb_table.shape
    scale = math.sqrt(float(emb_size))
    itemsize = jnp.dtype(emb_table.dtype).itemsize

    # tokens.long() -> int32 ids (vocab ids always fit in int32). The clamp to
    # [0, V-1] happens inside the kernel (nn.Embedding would error on OOB ids;
    # clamping is the closest safe TPU behavior).
    flat_tokens = tokens.reshape(-1).astype(jnp.int32)
    n_tok = flat_tokens.shape[0]

    # Token block size: multiple of 8 (sublane aligned), capped by block_tokens
    # AND by ceil(n_tok/2) so the grid has >=2 blocks whenever possible (lets
    # v7x shard the "parallel" axis across its 2 TensorCores).
    block_tokens = max(8, _round_up(block_tokens, 8))
    t_blk = max(8, min(block_tokens, _round_up((n_tok + 1) // 2, 8)))
    pad = (-n_tok) % t_blk
    n_padded = n_tok + pad
    # Pad with id 0 (a valid row); padded rows are discarded after the call.
    flat_padded = jnp.pad(flat_tokens, (0, pad))
    tok2d = flat_padded.reshape(n_padded, 1)

    # ---- VMEM budgeting / residency gate -----------------------------------
    table_bytes = vocab_size * emb_size * itemsize
    out_tile_bytes = t_blk * emb_size * itemsize
    tok_tile_bytes = t_blk * 4

    # Single-buffer the resident table (constant block index => the default
    # double buffer is pure VMEM waste) once it is big enough to matter; tiny
    # tables keep the default.
    if table_bytes >= (1 << 20):
        table_spec = pl.BlockSpec((vocab_size, emb_size), lambda i: (0, 0),
                                  pipeline_mode=pl.Buffered(1))
        table_buffers = 1
    else:
        table_spec = pl.BlockSpec((vocab_size, emb_size), lambda i: (0, 0))
        table_buffers = 2

    vmem_cap = _vmem_capacity_bytes()
    residency_budget = int(vmem_cap * 0.6)   # leave room for out/tok buffers + compiler scratch
    if table_bytes * table_buffers > residency_budget:
        # TODO(synk): large-vocab path — stream (Vt, E) vocab slices over a
        # second "arbitrary" grid axis, accumulating the one-hot matmul into a
        # VMEM scratch with pl.when init/finalize, instead of table residency.
        raise NotImplementedError(
            f"Embedding table ({table_bytes} B x {table_buffers} buffers) exceeds "
            f"the VMEM residency budget ({residency_budget} B) on this TPU.")

    slack = 16 * 1024 * 1024  # compiler scratch / headroom
    vmem_needed = (table_bytes * table_buffers
                   + 2 * out_tile_bytes
                   + 2 * tok_tile_bytes
                   + slack)
    vmem_limit = int(min(vmem_needed, vmem_cap))
    # -------------------------------------------------------------------------

    out_flat = pl.pallas_call(
        _make_emb_kernel(scale, vocab_size),
        out_shape=jax.ShapeDtypeStruct((n_padded, emb_size), emb_table.dtype),
        grid_spec=pltpu.PrefetchScalarGridSpec(
            num_scalar_prefetch=0,
            grid=(n_padded // t_blk,),
            in_specs=[
                # Token-id block for this grid step.
                pl.BlockSpec((t_blk, 1), lambda i: (i, 0)),
                # Whole embedding table, resident in VMEM (constant block index).
                table_spec,
            ],
            out_specs=pl.BlockSpec((t_blk, emb_size), lambda i: (i, 0)),
        ),
        compiler_params=pltpu.CompilerParams(
            dimension_semantics=("parallel",),
            vmem_limit_bytes=vmem_limit,
        ),
    )(tok2d, emb_table)

    return out_flat[:n_tok].reshape(tokens.shape + (emb_size,))


if __name__ == "__main__":
    # Small, deterministic setup consistent with the module:
    #   vocab_size=32, emb_size=128, tokens [B=2, S=8]
    vocab_size = 32
    emb_size = 128
    batch, seq = 2, 8

    key = jax.random.PRNGKey(0)
    k_w, k_t = jax.random.split(key)

    # nn.Embedding init ~ N(0, 1); deterministic synthetic weights here.
    emb_table = jax.random.normal(k_w, (vocab_size, emb_size), dtype=jnp.float32)
    tokens = jax.random.randint(k_t, (batch, seq), 0, vocab_size, dtype=jnp.int32)

    out = token_embedding(tokens, emb_table)
    out = jax.block_until_ready(out)

    # Reference check (plain JAX gather * sqrt(E)).
    ref = emb_table[tokens] * math.sqrt(emb_size)
    assert out.shape == (batch, seq, emb_size)
    assert jnp.allclose(out, ref, atol=1e-5, rtol=1e-5)

    print("KERNEL_OK")
</pallas_src>

<mosaic_0001>
module attributes {stable_mosaic.version = 11 : i64} {
  func.func @emb_kernel(%arg0: i32, %arg1: memref<8x1xi32, #tpu.memory_space<vmem>>, %arg2: memref<32x128xf32, #tpu.memory_space<vmem>>, %arg3: memref<8x128xf32, #tpu.memory_space<vmem>>) attributes {dimension_semantics = [#tpu.dimension_semantics<parallel>], iteration_bounds = array<i64: 2>, scalar_prefetch = 0 : i64, scratch_operands = 0 : i64, tpu.core_type = #tpu.core_type<tc>, window_params = [{transform_indices = @transform_0, window_bounds = array<i64: 8, 1>}, {pipeline_mode = #tpu.pipeline_mode<synchronous>, transform_indices = @transform_1, window_bounds = array<i64: 32, 128>}, {transform_indices = @transform_2, window_bounds = array<i64: 8, 128>}]} {
    %c0 = arith.constant 0 : index
    %c0_0 = arith.constant 0 : index
    %0 = vector.load %arg1[%c0, %c0_0] : memref<8x1xi32, #tpu.memory_space<vmem>>, vector<8x1xi32>
    %c0_i32 = arith.constant 0 : i32
    %c31_i32 = arith.constant 31 : i32
    %1 = vector.broadcast %c0_i32 : i32 to vector<8x1xi32>
    %2 = arith.maxsi %1, %0 : vector<8x1xi32>
    %3 = vector.broadcast %c31_i32 : i32 to vector<8x1xi32>
    %4 = arith.minsi %3, %2 : vector<8x1xi32>
    %5 = tpu.iota {dimensions = array<i32: 1>} : vector<8x32xi32>
    %6 = vector.broadcast %4 : vector<8x1xi32> to vector<8x32xi32>
    %7 = arith.cmpi eq, %5, %6 : vector<8x32xi32>
    %8 = arith.extui %7 : vector<8x32xi1> to vector<8x32xi32>
    %9 = arith.sitofp %8 : vector<8x32xi32> to vector<8x32xf32>
    %cst = arith.constant 11.3137083 : f32
    %10 = vector.broadcast %cst : f32 to vector<8x32xf32>
    %11 = arith.mulf %9, %10 : vector<8x32xf32>
    %c0_1 = arith.constant 0 : index
    %c0_2 = arith.constant 0 : index
    %12 = vector.load %arg2[%c0_1, %c0_2] : memref<32x128xf32, #tpu.memory_space<vmem>>, vector<32x128xf32>
    %cst_3 = arith.constant dense<0.000000e+00> : vector<8x128xf32>
    %13 = tpu.matmul %11, %12, %cst_3 {dimension_numbers = #tpu.dot_dimension_numbers<[1], [0], [0], [1], [0, 0, 1, 1], [], []>} : vector<8x32xf32>, vector<32x128xf32>, vector<8x128xf32> -> vector<8x128xf32>
    %c0_4 = arith.constant 0 : index
    %c0_5 = arith.constant 0 : index
    %14 = vector.load %arg3[%c0_4, %c0_5] : memref<8x128xf32, #tpu.memory_space<vmem>>, vector<8x128xf32>
    tpu.vector_store %arg3[%c0_4, %c0_5], %13 {strides = array<i32>} : memref<8x128xf32, #tpu.memory_space<vmem>>, vector<8x128xf32>,
    return
  }
  func.func @transform_0(%arg0: i32) -> (i32, i32) {
    %c0_i32 = arith.constant 0 : i32
    %c0_i32_0 = arith.constant 0 : i32
    return %arg0, %c0_i32 : i32, i32
  }
  func.func @transform_1(%arg0: i32) -> (i32, i32) {
    %c0_i32 = arith.constant 0 : i32
    %c0_i32_0 = arith.constant 0 : i32
    %c0_i32_1 = arith.constant 0 : i32
    return %c0_i32, %c0_i32_0 : i32, i32
  }
  func.func @transform_2(%arg0: i32) -> (i32, i32) {
    %c0_i32 = arith.constant 0 : i32
    %c0_i32_0 = arith.constant 0 : i32
    return %arg0, %c0_i32 : i32, i32
  }
}

</mosaic_0001>

<bundles_post_ra>
// kernel: tpu_custom_call.1
= control target key start
LH: loop header
LB: loop body
LE: loop exit
PB: predicated region body
PF: predicated region fallthrough
CT: control target
= control target key end

     0   :  { %7 = vsyncpa [#allocation3], 0  ;;  %s649_s0 = inlined_call_operand.vmem [shape: s32[16,1], index: 0, kind: input, shape index: {}]   ;;  %s650_s1 = inlined_call_operand.hbm [shape: f32[32,128], index: 1, kind: input, shape index: {}]   ;;  %s651_s2 = inlined_call_operand.hbm [shape: f32[16,128], index: 2, kind: output, shape index: {}]  }
   0x1   :  { %8 = vsyncpa [#allocation4], 0 }
   0x2   :  { %10 = vsyncpa [#allocation4 + $0x1], 0  ;;  %s532_s9 = smov 0   ;;  %s534_s10 = smov 0  }
   0x3   :  { %s536_s11 = smov 0   ;;  %s538_s12 = smov 0  }
   0x4 LB: > { %s553_s13 = sadd.s32 4294967295, %s508_s12   ;;  %s332_s14 = sadd.s32 4294967294, %s508_s12   ;;  %s508_s12 = sphi %s538_s12, %s659_s12   ;;  %s504_s11 = sphi %s536_s11, %s658_s11   ;;  %s500_s10 = sphi %s534_s10, %s657_s10   ;;  %s496_s9 = sphi %s532_s9, %s656_s9  }
   0x5   : > { %s557_s15 = sadd.s32 1, %s508_s12   ;;  %s70_s16 = sadd.s32 1, %s504_s11 }
   0x6   : > { %s67_s17 = ssub.s32 %s508_s12, %s557_s15  ;;  %p80_p0 = scmp.ne.s32.totalorder %s504_s11, %s500_s10 }
   0x7   : > { %p68_p1 = scmp.eq.s32.totalorder %s67_s17, 0  ;;  %p81_p2 = scmp.eq.s32.totalorder %s553_s13, 1 }
   0x8   : > { %p86_p3 = scmp.ne.s32.totalorder %s500_s10, %s496_s9  ;;  %p87_p4 = scmp.eq.s32.totalorder %s332_s14, 1 }
   0x9   : > { %s568_s18 = scalar_select %p68_p1, %s504_s11, %s70_s16  }
   0xa   : > { %p570_p5 = por %p81_p2, %p80_p0  ;;  %p574_p6 = por %p87_p4, %p86_p3 }
   0xb   : > { %p333_p7 = scmp.ge.s32.totalorder %s508_s12, 1  ;;  %p94_p8 = scmp.lt.s32.totalorder %s508_s12, 3 }
   0xc   : > { %s653_s20 = scalar_select %p574_p6, 1, 0 }
   0xd   : > { %p376_p9 = scmp.eq.s32.totalorder %s553_s13, 0  ;;  %p581_p10 = pnand %p333_p7, %p94_p8 }
   0xe   : > { %s510_s22 = smov [#allocation2]  }
   0xf   : > { %s106_s23 = sshll.u32 %s510_s22, 4  ;;  %p368_p11 = pneg %p581_p10  ;;  %s107_s23 = int_to_ptr.vmem [resolvable:$true] %s106_s23 }
  0x10   : > { %s429_s24 = scalar_lea.vmem %s107_s23, 512  ;;  %p437_p3 = scmp.lt.s32.totalorder %s107_s23, %s107_s23 }
  0x11   : > { %p369_p12 = pnand %p376_p9, %p368_p11  ;;  %p430_p0 = scmp.ne.s32.totalorder %s107_s23, %s429_s24 }
  0x12   : > { %p438_p4 = scmp.lt.s32.totalorder %s429_s24, %s429_s24 }
  0x13   : > { %p420_p13 = pneg %p369_p12 }
  0x14   : > { %p439_p6 = por %p438_p4, %p437_p3 }
  0x15   : > { %p432_p1 = pnand %p430_p0, %p420_p13 }
  0x17   : > { %p433_p2 = pneg %p432_p1 }
  0x19   : > { %p440_p7 = pnand %p439_p6, %p433_p2 }
  0x1b   : > { %443 = shalt.err (!%p440_p7)
}
  0x1c   : > { %s511_s25 = smov 128   ;;  %s512_s26 = smov 8  }
  0x1d   : > { %371 = dma.hbm_to_vmem [thread:$0]  (!%p369_p12), %s650_s1, 512, %s107_s23, [#allocation3], %s511_s25, %s511_s25, %s512_s26  }
  0x1e   : > { %129 = sbr.rel (%p581_p10) target bundleno = 382 (0x17e), region = 28 }
  0x23   : > { %487 = dma.done.wait (%p376_p9), [#allocation3], 512  }
  0x24   : > { %489 = vsyncadd (%p376_p9), [#allocation3], 4294966784  ;;  %p150_p8 = scmp.lt.s32.totalorder %s553_s13, 1  ;;  %v513_v0 = vmov 0   ;;  %v514_v1 = vmov 0.0   ;;  %v171_v3 = vld [vmem:[#allocation2 + $0x18] sm:$0xff]  ;;  %v159_v9 = vlaneseq }
  0x25   : > { %417 = vset.pattern.permute.xlu0 %v513_v0  ;;  %351 = vmatprep.subr.mxu0 %v514_v1  ;;  %v170_v4 = vld [vmem:[#allocation2 + $0x10] sm:$0xff]  ;;  %v169_v6 = vld [vmem:[#allocation2 + $0x8] sm:$0xff]  ;;  %v168_v8 = vld [vmem:[#allocation2] sm:$0xff]  ;;  %vm515_vm2 = vmmov 0   ;;  %vm172_vm4 = vcmask 261120   ;;  %s147_s6 = sand.u32 1, %s500_s10  }
  0x26   : > { %s151_s29 = scalar_select %p150_p8, %s553_s13, 1  ;;  %352 = vmatpush3.msra.mxu0 %v171_v3  ;;  %359 = vmatprep.mubr.msk.f32.mxu0 %vm515_vm2, %v514_v1  ;;  %v160_v10 = vand.u32 127, %v159_v9 }
  0x27   : > { %353 = vmatprep.subr.mxu0 %v514_v1  ;;  %s338_s7 = sshll.u32 %s147_s6, 3  ;;  %s343_s16 = sshll.u32 %s553_s13, 7 }
  0x28   : > { %s339_s30 = sshll.u32 %s151_s29, 3  ;;  %354 = vmatpush3.msra.mxu0 %v170_v4  ;;  %s149_s8 = scalar_lea.vmem [#allocation5], %s338_s7 }
  0x29   : > { %s153_s5 = scalar_lea.vmem %s649_s0, %s339_s30  ;;  %355 = vmatprep.subr.mxu0 %v514_v1  ;;  %s261_s14 = sshll.u32 %s149_s8, 4  ;;  %s605_s14 = int_to_ptr.vmem [resolvable:$true] %s261_s14 }
  0x2a   : > { %v154_v2 = vld [vmem:[%s153_s5] sm:$0xff]  ;;  %356 = vmatpush3.msra.mxu0 %v169_v6  ;;  %s610_s22 = scalar_lea.hbm %s651_s2, %s343_s16  ;;  %s248_s23 = scalar_lea.sflag [#allocation4], %s147_s6 }
  0x2b   : > { %vm155_vm0 = vcmp.gt.s32.totalorder %v154_v2, 0  ;;  %357 = vmatprep.subr.mxu0 %v514_v1  ;;  %s444_s24 = scalar_lea.vmem %s605_s14, 128  ;;  %s516_s13 = smov [#allocation5]  }
  0x2c   : > { %v156_v5 = vsel %vm155_vm0, %v154_v2, 0  ;;  %358 = vmatpush3.msra.mxu0 %v168_v8  ;;  %p445_p6 = scmp.ne.s32.totalorder %s605_s14, %s444_s24  ;;  %s448_s25 = sshll.u32 %s516_s13, 4  ;;  %s449_s25 = int_to_ptr.vmem [resolvable:$false] %s448_s25 }
  0x2d   : > { %vm157_vm1 = vcmp.lt.s32.totalorder %v156_v5, 31  ;;  %s450_s26 = scalar_lea.vmem %s449_s25, 256  ;;  %p451_p11 = scmp.lt.s32.totalorder %s605_s14, %s449_s25 }
  0x2e   : > { %v158_v7 = vsel %vm157_vm1, %v156_v5, 31  ;;  %p446_p9 = pnand %p445_p6, %p570_p5  ;;  %p452_p12 = scmp.lt.s32.totalorder %s450_s26, %s444_s24 }
  0x2f   : > { %162 = vperm.xlu0 %417, %v158_v7  }
  0x30   : > { %p447_p10 = pneg %p446_p9  ;;  %p453_p13 = por %p452_p12, %p451_p11 }
  0x32   : > { %p454_p0 = pnand %p453_p13, %p447_p10 }
  0xaa   : > { %v163_v11 = vpop.permute.xlu0 %162 }
  0xab   : > { %vm164_vm3 = vcmp.eq.s32.totalorder %v160_v10, %v163_v11 }
  0xac   : > { %v340_v12 = vsel %vm164_vm3, 1.0, %v514_v1 }
  0xad   : > { %v167_v13 = vmul.f32 11.313708, %v340_v12 }
  0xaf   : > { %360 = vmatmul.mubr.msk.f32.vlgmr.msra.gmra.mxu0 %vm172_vm4, %v167_v13 }
 0x16f   : > { %v242_v14 = vpop.f32.mrf.mxu0 }
 0x170   : > { %246 = vst [vmem:[%s149_s8] sm:$0xff] %v242_v14 }
 0x171   : > { %v361_v15 = vpop.f32.mrf.mxu0 }
 0x172   : > { %457 = shalt.err (!%p454_p0)
}
 0x173   : > { %s458_s27 = scalar_lea.hbm %s610_s22, 128  ;;  %s462_s30 = scalar_lea.hbm %s651_s2, 256 }
 0x174   : > { %p459_p1 = scmp.ne.s32.totalorder %s610_s22, %s458_s27  ;;  %p463_p4 = scmp.lt.s32.totalorder %s610_s22, %s651_s2 }
 0x175   : > { %p464_p7 = scmp.lt.s32.totalorder %s462_s30, %s458_s27 }
 0x176   : > { %p460_p2 = pnand %p459_p1, %p570_p5 }
 0x177   : > { %p465_p8 = por %p464_p7, %p463_p4 }
 0x178   : > { %p461_p3 = pneg %p460_p2 }
 0x17a   : > { %p466_p6 = pnand %p465_p8, %p461_p3 }
 0x17c   : > { %469 = shalt.err (!%p466_p6)
}
 0x17d   : > { %366 = dma.vmem_to_hbm [thread:$0]  (%p570_p5), %s605_s14, 128, %s610_s22, %s248_s23  }
 0x17e PF: > { %p378_p9 = scmp.ge.s32.totalorder %s508_s12, 2  ;;  %s273_s5 = sand.u32 1, %s496_s9  }
 0x17f   : > { %p655_p10 = scmp.ne.s32.totalorder %s653_s20, 0  ;;  %s274_s6 = scalar_lea.sflag [#allocation4], %s273_s5 }
 0x181   : > { %p373_p11 = pnand %p378_p9, %p655_p10 }
 0x183   : > { %p374_p12 = pneg %p373_p11 }
 0x185   : > { %491 = dma.done.wait (%p374_p12), %s274_s6, 128  }
 0x186   : > { %493 = vsyncadd (%p374_p12), %s274_s6, 4294967168  ;;  %p13_p13 = scmp.ge.s32.totalorder %s557_s15, 4   ;;  %s656_s9 = smov %s500_s10 }
 0x187   : > { %s657_s10 = smov %s504_s11  ;;  %s658_s11 = smov %s568_s18 }
 0x188   : > { %s659_s12 = smov %s557_s15  ;;  %15 = sbr.rel (!%p13_p13) target bundleno = 4 (0x4), region = 68 }
 0x18d   :  { %279 = vsyncpa [#allocation3], 1 }
 0x18e   :  { %281 = vsyncpa [#allocation3 + $0x1], 1 }
 0x18f   :  { %282 = vsyncpa [#allocation4], 1 }
 0x190   :  { %284 = vsyncpa [#allocation4 + $0x1], 1 }

</bundles_post_ra>
